<compile_context>
chip_gen: v7x
topology: tpu7x:2x2x1
jax: 0.10.0
libtpu: 0.0.40
codegen_flags: <defaults>
</compile_context>

<pallas_src>
import jax
import jax.numpy as jnp
from jax.experimental import pallas as pl
from jax.experimental.pallas import tpu as pltpu


def _make_coordatt_kernel(nb, c, h, w, oup):
    hw = h * w
    l = h + w

    def kernel(x_ref, pool_ref, w1_ref, b1_ref, w2_ref, b2_ref,
               w3_ref, b3_ref, eh_ref, ew_ref, o_ref):
        # (nb, c, hw) -> (nb*c, hw): leading-dim merge, no relayout, lane-dense.
        xf = x_ref[...].reshape(nb * c, hw)

        # --- coordinate pooling as one lane-dense matmul ---------------------
        #   columns [0:h)   -> mean over W  (pool_h branch)
        #   columns [h:h+w) -> mean over H  (pool_w branch)
        y = jnp.dot(xf, pool_ref[...],
                    preferred_element_type=jnp.float32)        # (nb*c, l)

        # Regroup (tiny tensor) so the shared conv1 contracts over channels
        # with a lane dimension of nb*l.  Watch item only: small XLU relayout.
        yt = y.reshape(nb, c, l).transpose(1, 0, 2).reshape(c, nb * l)

        # --- shared 1x1 conv (BN + bias folded) + h_swish ---------------------
        z = jnp.dot(w1_ref[...], yt,
                    preferred_element_type=jnp.float32) + b1_ref[...]
        z = z * jnp.clip(z + 3.0, 0.0, 6.0) * (1.0 / 6.0)      # (mip, nb*l)

        # --- conv2 / conv3 as two separate tiny matmuls + sigmoid -------------
        # (keeps sublane offsets aligned; no stacked-weight slice needed)
        ah = jax.nn.sigmoid(
            jnp.dot(w2_ref[...], z,
                    preferred_element_type=jnp.float32) + b2_ref[...])  # (oup, nb*l)
        aw = jax.nn.sigmoid(
            jnp.dot(w3_ref[...], z,
                    preferred_element_type=jnp.float32) + b3_ref[...])  # (oup, nb*l)

        # Rearrange the tiny attention tensors to row order matching xf rows
        # (batch-major, channel-minor): (oup, nb, l) -> (nb*oup, l).
        ah_m = ah.reshape(oup, nb, l).transpose(1, 0, 2).reshape(nb * oup, l)
        aw_m = aw.reshape(oup, nb, l).transpose(1, 0, 2).reshape(nb * oup, l)

        # --- lane-dense gate build on the MXU ---------------------------------
        #   eh_ref: (l, hw) picks the h-branch columns and broadcasts over W
        #   ew_ref: (l, hw) picks the w-branch columns and broadcasts over H
        gate = (jnp.dot(ah_m, eh_ref[...], preferred_element_type=jnp.float32) *
                jnp.dot(aw_m, ew_ref[...], preferred_element_type=jnp.float32))

        # --- gating: out = x * a_w * a_h (all lane-dense) ---------------------
        o_ref[...] = (xf * gate).reshape(nb, c, hw).astype(o_ref.dtype)

    return kernel


def coord_att(x, params, *, nb=None):
    n, c, h, w = x.shape
    hw = h * w
    l = h + w
    w1, b1, g, beta, mu, var, w2, b2, w3, b3 = params
    mip, oup = w1.shape[0], w2.shape[0]
    assert oup == c, f"CoordAtt gating requires oup == C (got oup={oup}, C={c})"
    assert w3.shape[0] == oup

    # Fold inference BatchNorm + conv1 bias into the conv1 weight / bias.
    scale = g * jax.lax.rsqrt(var + 1e-5)                      # (mip, 1)
    w1f = w1 * scale                                           # (mip, C)
    b1f = b1 * scale + (beta - mu * scale)                     # (mip, 1)

    # Constant pooling matrix: (hw, h+w).
    rows = jnp.arange(hw)
    ph = ((rows // w)[:, None] == jnp.arange(h)[None, :]).astype(jnp.float32) / w
    pw = ((rows % w)[:, None] == jnp.arange(w)[None, :]).astype(jnp.float32) / h
    pool = jnp.concatenate([ph, pw], axis=1)                   # (hw, l)

    # Constant gate-expansion matrices (l, hw):
    #   eh rows [0:h)  : eh[i, k] = 1 iff k // w == i   (broadcast a_h over W)
    #   ew rows [h:l)  : ew[h+j, k] = 1 iff k % w == j  (broadcast a_w over H)
    eh_top = (jnp.arange(h)[:, None] == (rows // w)[None, :]).astype(jnp.float32)
    ew_bot = (jnp.arange(w)[:, None] == (rows % w)[None, :]).astype(jnp.float32)
    eh = jnp.concatenate([eh_top, jnp.zeros((w, hw), jnp.float32)], axis=0)
    ew = jnp.concatenate([jnp.zeros((h, hw), jnp.float32), ew_bot], axis=0)

    x_flat = x.reshape(n, c, hw)

    # Batch elements per grid step: target ~4 MiB of x per block (amortizes
    # per-step pipeline overhead), but keep at least 2 grid steps so the
    # "parallel" batch axis can shard across both v7x TensorCores.
    if nb is None:
        per_elem_bytes = c * hw * x.dtype.itemsize
        nb = max(1, min(n, (4 * 1024 * 1024) // max(per_elem_bytes, 1)))
        if n >= 2:
            nb = max(1, min(nb, n // 2))
        while n % nb:
            nb -= 1
    assert n % nb == 0

    block_bytes = nb * c * hw * x.dtype.itemsize
    # ~4x block for double-buffered I/O + ~3x block for in-kernel f32 temps
    # (xf, gate, product), with headroom; cap at 48 MiB for v7x's 64 MiB VMEM.
    vmem_limit = int(min(48 * 1024 * 1024,
                         max(32 * 1024 * 1024, 10 * block_bytes)))

    kernel = _make_coordatt_kernel(nb, c, h, w, oup)

    out_flat = pl.pallas_call(
        kernel,
        out_shape=jax.ShapeDtypeStruct((n, c, hw), x.dtype),
        grid=(n // nb,),
        in_specs=[
            pl.BlockSpec((nb, c, hw), lambda i: (i, 0, 0)),    # x (lane-dense)
            pl.BlockSpec((hw, l), lambda i: (0, 0)),           # pooling matrix
            pl.BlockSpec((mip, c), lambda i: (0, 0)),          # folded conv1 w
            pl.BlockSpec((mip, 1), lambda i: (0, 0)),          # folded conv1 b
            pl.BlockSpec((oup, mip), lambda i: (0, 0)),        # conv2 w
            pl.BlockSpec((oup, 1), lambda i: (0, 0)),          # conv2 b
            pl.BlockSpec((oup, mip), lambda i: (0, 0)),        # conv3 w
            pl.BlockSpec((oup, 1), lambda i: (0, 0)),          # conv3 b
            pl.BlockSpec((l, hw), lambda i: (0, 0)),           # Eh expansion
            pl.BlockSpec((l, hw), lambda i: (0, 0)),           # Ew expansion
        ],
        out_specs=pl.BlockSpec((nb, c, hw), lambda i: (i, 0, 0)),
        compiler_params=pltpu.CompilerParams(
            dimension_semantics=("parallel",),
            vmem_limit_bytes=vmem_limit),
    )(x_flat, pool, w1f, b1f, w2, b2, w3, b3, eh, ew)

    return out_flat.reshape(n, c, h, w)


def coord_att_ref(x, params):
    """Pure-JAX reference (same inference-BN semantics) for validation."""
    w1, b1, g, beta, mu, var, w2, b2, w3, b3 = params
    xh = jnp.mean(x, axis=3)            # (N, C, H)
    xw = jnp.mean(x, axis=2)            # (N, C, W)

    def branch(v):                      # (N, C, L)
        z = jnp.einsum('mc,ncl->nml', w1, v) + b1[None]
        z = (z - mu[None]) * (g[None] / jnp.sqrt(var[None] + 1e-5)) + beta[None]
        return z * jnp.clip(z + 3.0, 0.0, 6.0) / 6.0

    zh = branch(xh)
    zw = branch(xw)
    ah = jax.nn.sigmoid(jnp.einsum('om,nml->nol', w2, zh) + b2[None])
    aw = jax.nn.sigmoid(jnp.einsum('om,nml->nol', w3, zw) + b3[None])
    return x * aw[:, :, None, :] * ah[:, :, :, None]


if __name__ == "__main__":
    N, C, H, W = 2, 4, 16, 16
    groups = 32
    mip = max(8, C // groups)           # = 8
    oup = C                             # output channels must equal C for gating

    key = jax.random.PRNGKey(0)
    ks = jax.random.split(key, 8)
    x = jax.random.normal(ks[0], (N, C, H, W), jnp.float32)

    # deterministic synthetic parameters (no checkpoint load)
    w1 = jax.random.normal(ks[1], (mip, C), jnp.float32) * 0.1
    b1 = jax.random.normal(ks[2], (mip, 1), jnp.float32) * 0.1
    gamma = jnp.ones((mip, 1), jnp.float32)
    beta = jnp.zeros((mip, 1), jnp.float32)
    mu = jnp.zeros((mip, 1), jnp.float32)
    var = jnp.ones((mip, 1), jnp.float32)
    w2 = jax.random.normal(ks[3], (oup, mip), jnp.float32) * 0.1
    b2 = jax.random.normal(ks[4], (oup, 1), jnp.float32) * 0.1
    w3 = jax.random.normal(ks[5], (oup, mip), jnp.float32) * 0.1
    b3 = jax.random.normal(ks[6], (oup, 1), jnp.float32) * 0.1

    params = (w1, b1, gamma, beta, mu, var, w2, b2, w3, b3)

    out = coord_att(x, params)
    jax.block_until_ready(out)

    ref = coord_att_ref(x, params)
    err = float(jnp.max(jnp.abs(out - ref)))
    assert out.shape == (N, C, H, W)
    assert err < 1e-4, f"max abs error {err}"
    print("KERNEL_OK")
</pallas_src>

<mosaic_0001>
module attributes {stable_mosaic.version = 11 : i64} {
  func.func @kernel(%arg0: i32, %arg1: memref<1x4x256xf32, #tpu.memory_space<vmem>>, %arg2: memref<256x32xf32, #tpu.memory_space<vmem>>, %arg3: memref<8x4xf32, #tpu.memory_space<vmem>>, %arg4: memref<8x1xf32, #tpu.memory_space<vmem>>, %arg5: memref<4x8xf32, #tpu.memory_space<vmem>>, %arg6: memref<4x1xf32, #tpu.memory_space<vmem>>, %arg7: memref<4x8xf32, #tpu.memory_space<vmem>>, %arg8: memref<4x1xf32, #tpu.memory_space<vmem>>, %arg9: memref<32x256xf32, #tpu.memory_space<vmem>>, %arg10: memref<32x256xf32, #tpu.memory_space<vmem>>, %arg11: memref<1x4x256xf32, #tpu.memory_space<vmem>>) attributes {dimension_semantics = [#tpu.dimension_semantics<parallel>], iteration_bounds = array<i64: 2>, scalar_prefetch = 0 : i64, scratch_operands = 0 : i64, tpu.core_type = #tpu.core_type<tc>, window_params = [{transform_indices = @transform_0, window_bounds = array<i64: 1, 4, 256>}, {pipeline_mode = #tpu.pipeline_mode<synchronous>, transform_indices = @transform_1, window_bounds = array<i64: 256, 32>}, {pipeline_mode = #tpu.pipeline_mode<synchronous>, transform_indices = @transform_2, window_bounds = array<i64: 8, 4>}, {pipeline_mode = #tpu.pipeline_mode<synchronous>, transform_indices = @transform_3, window_bounds = array<i64: 8, 1>}, {pipeline_mode = #tpu.pipeline_mode<synchronous>, transform_indices = @transform_4, window_bounds = array<i64: 4, 8>}, {pipeline_mode = #tpu.pipeline_mode<synchronous>, transform_indices = @transform_5, window_bounds = array<i64: 4, 1>}, {pipeline_mode = #tpu.pipeline_mode<synchronous>, transform_indices = @transform_6, window_bounds = array<i64: 4, 8>}, {pipeline_mode = #tpu.pipeline_mode<synchronous>, transform_indices = @transform_7, window_bounds = array<i64: 4, 1>}, {pipeline_mode = #tpu.pipeline_mode<synchronous>, transform_indices = @transform_8, window_bounds = array<i64: 32, 256>}, {pipeline_mode = #tpu.pipeline_mode<synchronous>, transform_indices = @transform_9, window_bounds = array<i64: 32, 256>}, {transform_indices = @transform_10, window_bounds = array<i64: 1, 4, 256>}]} {
    %c0 = arith.constant 0 : index
    %c0_0 = arith.constant 0 : index
    %c0_1 = arith.constant 0 : index
    %0 = vector.load %arg1[%c0, %c0_0, %c0_1] : memref<1x4x256xf32, #tpu.memory_space<vmem>>, vector<1x4x256xf32>
    %1 = vector.shape_cast %0 : vector<1x4x256xf32> to vector<4x256xf32>
    %c0_2 = arith.constant 0 : index
    %c0_3 = arith.constant 0 : index
    %2 = vector.load %arg2[%c0_2, %c0_3] : memref<256x32xf32, #tpu.memory_space<vmem>>, vector<256x32xf32>
    %cst = arith.constant dense<0.000000e+00> : vector<4x32xf32>
    %3 = tpu.matmul %1, %2, %cst {dimension_numbers = #tpu.dot_dimension_numbers<[1], [0], [0], [1], [0, 0, 1, 1], [], []>} : vector<4x256xf32>, vector<256x32xf32>, vector<4x32xf32> -> vector<4x32xf32>
    %4 = vector.shape_cast %3 : vector<4x32xf32> to vector<1x4x32xf32>
    %5 = tpu.transpose %4, [1, 0, 2] : vector<1x4x32xf32> -> vector<4x1x32xf32>
    %6 = vector.shape_cast %5 : vector<4x1x32xf32> to vector<4x32xf32>
    %c0_4 = arith.constant 0 : index
    %c0_5 = arith.constant 0 : index
    %7 = vector.load %arg3[%c0_4, %c0_5] : memref<8x4xf32, #tpu.memory_space<vmem>>, vector<8x4xf32>
    %cst_6 = arith.constant dense<0.000000e+00> : vector<8x32xf32>
    %8 = tpu.matmul %7, %6, %cst_6 {dimension_numbers = #tpu.dot_dimension_numbers<[1], [0], [0], [1], [0, 0, 1, 1], [], []>} : vector<8x4xf32>, vector<4x32xf32>, vector<8x32xf32> -> vector<8x32xf32>
    %c0_7 = arith.constant 0 : index
    %c0_8 = arith.constant 0 : index
    %9 = vector.load %arg4[%c0_7, %c0_8] : memref<8x1xf32, #tpu.memory_space<vmem>>, vector<8x1xf32>
    %10 = vector.broadcast %9 : vector<8x1xf32> to vector<8x32xf32>
    %11 = arith.addf %8, %10 : vector<8x32xf32>
    %cst_9 = arith.constant 3.000000e+00 : f32
    %12 = vector.broadcast %cst_9 : f32 to vector<8x32xf32>
    %13 = arith.addf %11, %12 : vector<8x32xf32>
    %cst_10 = arith.constant 0.000000e+00 : f32
    %cst_11 = arith.constant 6.000000e+00 : f32
    %14 = vector.broadcast %cst_10 : f32 to vector<8x32xf32>
    %15 = arith.maximumf %14, %13 : vector<8x32xf32>
    %16 = vector.broadcast %cst_11 : f32 to vector<8x32xf32>
    %17 = arith.minimumf %16, %15 : vector<8x32xf32>
    %18 = arith.mulf %11, %17 : vector<8x32xf32>
    %cst_12 = arith.constant 0.166666672 : f32
    %19 = vector.broadcast %cst_12 : f32 to vector<8x32xf32>
    %20 = arith.mulf %18, %19 : vector<8x32xf32>
    %c0_13 = arith.constant 0 : index
    %c0_14 = arith.constant 0 : index
    %21 = vector.load %arg5[%c0_13, %c0_14] : memref<4x8xf32, #tpu.memory_space<vmem>>, vector<4x8xf32>
    %cst_15 = arith.constant dense<0.000000e+00> : vector<4x32xf32>
    %22 = tpu.matmul %21, %20, %cst_15 {dimension_numbers = #tpu.dot_dimension_numbers<[1], [0], [0], [1], [0, 0, 1, 1], [], []>} : vector<4x8xf32>, vector<8x32xf32>, vector<4x32xf32> -> vector<4x32xf32>
    %c0_16 = arith.constant 0 : index
    %c0_17 = arith.constant 0 : index
    %23 = vector.load %arg6[%c0_16, %c0_17] : memref<4x1xf32, #tpu.memory_space<vmem>>, vector<4x1xf32>
    %24 = vector.broadcast %23 : vector<4x1xf32> to vector<4x32xf32>
    %25 = arith.addf %22, %24 : vector<4x32xf32>
    %26 = arith.negf %25 : vector<4x32xf32>
    %27 = math.exp %26 : vector<4x32xf32>
    %cst_18 = arith.constant 1.000000e+00 : f32
    %28 = vector.broadcast %cst_18 : f32 to vector<4x32xf32>
    %29 = arith.addf %28, %27 : vector<4x32xf32>
    %30 = arith.divf %28, %29 : vector<4x32xf32>
    %c0_19 = arith.constant 0 : index
    %c0_20 = arith.constant 0 : index
    %31 = vector.load %arg7[%c0_19, %c0_20] : memref<4x8xf32, #tpu.memory_space<vmem>>, vector<4x8xf32>
    %cst_21 = arith.constant dense<0.000000e+00> : vector<4x32xf32>
    %32 = tpu.matmul %31, %20, %cst_21 {dimension_numbers = #tpu.dot_dimension_numbers<[1], [0], [0], [1], [0, 0, 1, 1], [], []>} : vector<4x8xf32>, vector<8x32xf32>, vector<4x32xf32> -> vector<4x32xf32>
    %c0_22 = arith.constant 0 : index
    %c0_23 = arith.constant 0 : index
    %33 = vector.load %arg8[%c0_22, %c0_23] : memref<4x1xf32, #tpu.memory_space<vmem>>, vector<4x1xf32>
    %34 = vector.broadcast %33 : vector<4x1xf32> to vector<4x32xf32>
    %35 = arith.addf %32, %34 : vector<4x32xf32>
    %36 = arith.negf %35 : vector<4x32xf32>
    %37 = math.exp %36 : vector<4x32xf32>
    %cst_24 = arith.constant 1.000000e+00 : f32
    %38 = vector.broadcast %cst_24 : f32 to vector<4x32xf32>
    %39 = arith.addf %38, %37 : vector<4x32xf32>
    %40 = arith.divf %38, %39 : vector<4x32xf32>
    %41 = vector.shape_cast %30 : vector<4x32xf32> to vector<4x1x32xf32>
    %42 = tpu.transpose %41, [1, 0, 2] : vector<4x1x32xf32> -> vector<1x4x32xf32>
    %43 = vector.shape_cast %42 : vector<1x4x32xf32> to vector<4x32xf32>
    %44 = vector.shape_cast %40 : vector<4x32xf32> to vector<4x1x32xf32>
    %45 = tpu.transpose %44, [1, 0, 2] : vector<4x1x32xf32> -> vector<1x4x32xf32>
    %46 = vector.shape_cast %45 : vector<1x4x32xf32> to vector<4x32xf32>
    %c0_25 = arith.constant 0 : index
    %c0_26 = arith.constant 0 : index
    %47 = vector.load %arg9[%c0_25, %c0_26] : memref<32x256xf32, #tpu.memory_space<vmem>>, vector<32x256xf32>
    %cst_27 = arith.constant dense<0.000000e+00> : vector<4x256xf32>
    %48 = tpu.matmul %43, %47, %cst_27 {dimension_numbers = #tpu.dot_dimension_numbers<[1], [0], [0], [1], [0, 0, 1, 1], [], []>} : vector<4x32xf32>, vector<32x256xf32>, vector<4x256xf32> -> vector<4x256xf32>
    %c0_28 = arith.constant 0 : index
    %c0_29 = arith.constant 0 : index
    %49 = vector.load %arg10[%c0_28, %c0_29] : memref<32x256xf32, #tpu.memory_space<vmem>>, vector<32x256xf32>
    %cst_30 = arith.constant dense<0.000000e+00> : vector<4x256xf32>
    %50 = tpu.matmul %46, %49, %cst_30 {dimension_numbers = #tpu.dot_dimension_numbers<[1], [0], [0], [1], [0, 0, 1, 1], [], []>} : vector<4x32xf32>, vector<32x256xf32>, vector<4x256xf32> -> vector<4x256xf32>
    %51 = arith.mulf %48, %50 : vector<4x256xf32>
    %52 = arith.mulf %1, %51 : vector<4x256xf32>
    %53 = vector.shape_cast %52 : vector<4x256xf32> to vector<1x4x256xf32>
    %c0_31 = arith.constant 0 : index
    %c0_32 = arith.constant 0 : index
    %c0_33 = arith.constant 0 : index
    %54 = vector.load %arg11[%c0_31, %c0_32, %c0_33] : memref<1x4x256xf32, #tpu.memory_space<vmem>>, vector<1x4x256xf32>
    tpu.vector_store %arg11[%c0_31, %c0_32, %c0_33], %53 {strides = array<i32>} : memref<1x4x256xf32, #tpu.memory_space<vmem>>, vector<1x4x256xf32>,
    return
  }
  func.func @transform_0(%arg0: i32) -> (i32, i32, i32) {
    %c0_i32 = arith.constant 0 : i32
    %c0_i32_0 = arith.constant 0 : i32
    %c0_i32_1 = arith.constant 0 : i32
    return %arg0, %c0_i32, %c0_i32_0 : i32, i32, i32
  }
  func.func @transform_1(%arg0: i32) -> (i32, i32) {
    %c0_i32 = arith.constant 0 : i32
    %c0_i32_0 = arith.constant 0 : i32
    %c0_i32_1 = arith.constant 0 : i32
    return %c0_i32, %c0_i32_0 : i32, i32
  }
  func.func @transform_2(%arg0: i32) -> (i32, i32) {
    %c0_i32 = arith.constant 0 : i32
    %c0_i32_0 = arith.constant 0 : i32
    %c0_i32_1 = arith.constant 0 : i32
    return %c0_i32, %c0_i32_0 : i32, i32
  }
  func.func @transform_3(%arg0: i32) -> (i32, i32) {
    %c0_i32 = arith.constant 0 : i32
    %c0_i32_0 = arith.constant 0 : i32
    %c0_i32_1 = arith.constant 0 : i32
    return %c0_i32, %c0_i32_0 : i32, i32
  }
  func.func @transform_4(%arg0: i32) -> (i32, i32) {
    %c0_i32 = arith.constant 0 : i32
    %c0_i32_0 = arith.constant 0 : i32
    %c0_i32_1 = arith.constant 0 : i32
    return %c0_i32, %c0_i32_0 : i32, i32
  }
  func.func @transform_5(%arg0: i32) -> (i32, i32) {
    %c0_i32 = arith.constant 0 : i32
    %c0_i32_0 = arith.constant 0 : i32
    %c0_i32_1 = arith.constant 0 : i32
    return %c0_i32, %c0_i32_0 : i32, i32
  }
  func.func @transform_6(%arg0: i32) -> (i32, i32) {
    %c0_i32 = arith.constant 0 : i32
    %c0_i32_0 = arith.constant 0 : i32
    %c0_i32_1 = arith.constant 0 : i32
    return %c0_i32, %c0_i32_0 : i32, i32
  }
  func.func @transform_7(%arg0: i32) -> (i32, i32) {
    %c0_i32 = arith.constant 0 : i32
    %c0_i32_0 = arith.constant 0 : i32
    %c0_i32_1 = arith.constant 0 : i32
    return %c0_i32, %c0_i32_0 : i32, i32
  }
  func.func @transform_8(%arg0: i32) -> (i32, i32) {
    %c0_i32 = arith.constant 0 : i32
    %c0_i32_0 = arith.constant 0 : i32
    %c0_i32_1 = arith.constant 0 : i32
    return %c0_i32, %c0_i32_0 : i32, i32
  }
  func.func @transform_9(%arg0: i32) -> (i32, i32) {
    %c0_i32 = arith.constant 0 : i32
    %c0_i32_0 = arith.constant 0 : i32
    %c0_i32_1 = arith.constant 0 : i32
    return %c0_i32, %c0_i32_0 : i32, i32
  }
  func.func @transform_10(%arg0: i32) -> (i32, i32, i32) {
    %c0_i32 = arith.constant 0 : i32
    %c0_i32_0 = arith.constant 0 : i32
    %c0_i32_1 = arith.constant 0 : i32
    return %arg0, %c0_i32, %c0_i32_0 : i32, i32, i32
  }
}

</mosaic_0001>

<bundles_post_ra>
// kernel: tpu_custom_call.1
= control target key start
LH: loop header
LB: loop body
LE: loop exit
PB: predicated region body
PF: predicated region fallthrough
CT: control target
= control target key end

     0   :  { %15 = vsyncpa [#allocation3], 0  ;;  %s1705_s0 = inlined_call_operand.vmem [shape: f32[2,4,256], index: 0, kind: input, shape index: {}]   ;;  %s1706_s1 = inlined_call_operand.vmem [shape: f32[256,32], index: 1, kind: input, shape index: {}]   ;;  %s1707_s2 = inlined_call_operand.vmem [shape: f32[8,4], index: 2, kind: input, shape index: {}]   ;;  %s1708_s3 = inlined_call_operand.vmem [shape: f32[8,1], index: 3, kind: input, shape index: {}]   ;;  %s1709_s4 = inlined_call_operand.vmem [shape: f32[4,8], index: 4, kind: input, shape index: {}]   ;;  %s1710_s5 = inlined_call_operand.vmem [shape: f32[4,1], index: 5, kind: input, shape index: {}]   ;;  %s1711_s6 = inlined_call_operand.vmem [shape: f32[4,8], index: 6, kind: input, shape index: {}]   ;;  %s1712_s7 = inlined_call_operand.vmem [shape: f32[4,1], index: 7, kind: input, shape index: {}]   ;;  %s1713_s8 = inlined_call_operand.vmem [shape: f32[32,256], index: 8, kind: input, shape index: {}]   ;;  %s1714_s9 = inlined_call_operand.vmem [shape: f32[32,256], index: 9, kind: input, shape index: {}]   ;;  %s1715_s10 = inlined_call_operand.hbm [shape: f32[2,4,256], index: 10, kind: output, shape index: {}]  }
   0x1   :  { %17 = vsyncpa [#allocation3 + $0x1], 0  ;;  %s1416_s13 = smov 0   ;;  %s1418_s14 = smov 0  }
   0x2   :  { %s1420_s15 = smov 0   ;;  %s1422_s16 = smov 0  }
   0x3 LB: > { %s1437_s17 = sadd.s32 4294967295, %s1352_s16   ;;  %s1106_s18 = sadd.s32 4294967294, %s1352_s16   ;;  %s1352_s16 = sphi %s1422_s16, %s1723_s16   ;;  %s1348_s15 = sphi %s1420_s15, %s1722_s15   ;;  %s1344_s14 = sphi %s1418_s14, %s1721_s14   ;;  %s1340_s13 = sphi %s1416_s13, %s1720_s13  }
   0x4   : > { %s1441_s19 = sadd.s32 1, %s1352_s16   ;;  %s245_s20 = sadd.s32 1, %s1348_s15 }
   0x5   : > { %s242_s21 = ssub.s32 %s1352_s16, %s1441_s19  ;;  %p255_p0 = scmp.ne.s32.totalorder %s1348_s15, %s1344_s14 }
   0x6   : > { %p243_p1 = scmp.eq.s32.totalorder %s242_s21, 0  ;;  %p256_p2 = scmp.eq.s32.totalorder %s1437_s17, 1 }
   0x7   : > { %p261_p3 = scmp.ne.s32.totalorder %s1344_s14, %s1340_s13  ;;  %p262_p4 = scmp.eq.s32.totalorder %s1106_s18, 1 }
   0x8   : > { %s1452_s22 = scalar_select %p243_p1, %s1348_s15, %s245_s20  }
   0x9   : > { %p1454_p5 = por %p256_p2, %p255_p0  ;;  %p1458_p6 = por %p262_p4, %p261_p3 }
   0xa   : > { %1716 = sst [smem:[#allocation5_spill]] %s1452_s22  ;;  %p1109_p7 = scmp.ge.s32.totalorder %s1352_s16, 1 }
   0xb   : > { %p315_p8 = scmp.lt.s32.totalorder %s1352_s16, 3 }
   0xd   : > { %p316_p9 = pnand %p1109_p7, %p315_p8 }
   0xe   : > { %v375_v0 = vld [vmem:[%s1706_s1 + $0x80] sm:$0xff] (!%p316_p9)  ;;  %v376_v1 = vld [vmem:[%s1706_s1 + $0x88] sm:$0xff] (!%p316_p9)  ;;  %p353_p10 = scmp.lt.s32.totalorder (!%p316_p9), %s1437_s17, 1  ;;  %v377_v5 = vld [vmem:[%s1706_s1 + $0x90] sm:$0xff] (!%p316_p9)  ;;  %v1354_v50 = vmov (!%p316_p9), 0.0   ;;  %vm1355_vm0 = vmmov (!%p316_p9), 0   ;;  %v467_v56 = vlaneseq (!%p316_p9) }
   0xf   : > { %319 = sbr.rel (%p316_p9) target bundleno = 996 (0x3e4), region = 60  ;;  %v359_v2 = vld [vmem:[%s1706_s1] sm:$0xff] (!%p316_p9)  ;;  %v1186_v3 = vpack.c.bf16 (!%p316_p9), %v376_v1, %v375_v0  ;;  %v360_v4 = vld [vmem:[%s1706_s1 + $0x8] sm:$0xff] (!%p316_p9)  ;;  %v378_v6 = vld [vmem:[%s1706_s1 + $0x98] sm:$0xff] (!%p316_p9)  ;;  %1171 = vmatprep.subr.mxu1 (!%p316_p9), %v1354_v50  ;;  %1173 = vmatprep.mubr.msk.f32.mxu1 (!%p316_p9), %vm1355_vm0, %v1354_v50  ;;  %v1356_v52 = vmov (!%p316_p9), 0   ;;  %vm500_vm1 = vcmask (!%p316_p9), 1041409  }
  0x10   : > { %v1188_v7 = vpack.c.bf16 (!%p316_p9), %v360_v4, %v359_v2  ;;  %v1190_v8 = vpack.c.bf16 (!%p316_p9), %v378_v6, %v377_v5  ;;  %v361_v9 = vld [vmem:[%s1706_s1 + $0x10] sm:$0xff] (!%p316_p9)  ;;  %v362_v10 = vld [vmem:[%s1706_s1 + $0x18] sm:$0xff] (!%p316_p9)  ;;  %v379_v11 = vld [vmem:[%s1706_s1 + $0xa0] sm:$0xff] (!%p316_p9)  ;;  %1279 = vset.pattern.permute.xlu0 (!%p316_p9), %v1356_v52  ;;  %1280 = vset.pattern.permute.xlu1 (!%p316_p9), %v1356_v52  ;;  %v1357_v54 = vmov (!%p316_p9), 1983009808   ;;  %v1579_v60 = vshrl.u32 (!%p316_p9), %v467_v56, 7 }
  0x11   : > { %1187 = vmatprep.subr.bf16.mxu0 (!%p316_p9), %v1186_v3  ;;  %v380_v12 = vld [vmem:[%s1706_s1 + $0xa8] sm:$0xff] (!%p316_p9)  ;;  %v1192_v13 = vpack.c.bf16 (!%p316_p9), %v362_v10, %v361_v9  ;;  %v363_v15 = vld [vmem:[%s1706_s1 + $0x20] sm:$0xff] (!%p316_p9)  ;;  %v381_v17 = vld [vmem:[%s1706_s1 + $0xb0] sm:$0xff] (!%p316_p9)  ;;  %v465_v55 = vunpack.c.l.s4 (!%p316_p9), %v1357_v54  ;;  %v1358_v57 = vmov (!%p316_p9), 1934713408   ;;  %vm503_vm2 = vcmask (!%p316_p9), 1042434  }
  0x12   : > { %1189 = vmatpush3.bf16.msra.mxu0 (!%p316_p9), %v1188_v7  ;;  %v1194_v14 = vpack.c.bf16 (!%p316_p9), %v380_v12, %v379_v11  ;;  %v364_v16 = vld [vmem:[%s1706_s1 + $0x28] sm:$0xff] (!%p316_p9)  ;;  %v382_v18 = vld [vmem:[%s1706_s1 + $0xb8] sm:$0xff] (!%p316_p9)  ;;  %v365_v21 = vld [vmem:[%s1706_s1 + $0x30] sm:$0xff] (!%p316_p9)  ;;  %v473_v58 = vunpack.c.l.s4 (!%p316_p9), %v1358_v57  ;;  %vm506_vm3 = vcmask (!%p316_p9), 1043459   ;;  %vm512_vm4 = vcmask (!%p316_p9), 1043456  }
  0x13   : > { %1191 = vmatprep.subr.bf16.mxu0 (!%p316_p9), %v1190_v8  ;;  %v1196_v19 = vpack.c.bf16 (!%p316_p9), %v364_v16, %v363_v15  ;;  %v1198_v20 = vpack.c.bf16 (!%p316_p9), %v382_v18, %v381_v17  ;;  %v366_v22 = vld [vmem:[%s1706_s1 + $0x38] sm:$0xff] (!%p316_p9)  ;;  %v383_v23 = vld [vmem:[%s1706_s1 + $0xc0] sm:$0xff] (!%p316_p9)  ;;  %v384_v24 = vld [vmem:[%s1706_s1 + $0xc8] sm:$0xff] (!%p316_p9)  ;;  %v466_v59 = vunpack.c.0.s8 (!%p316_p9), %v465_v55  ;;  %vm508_vm5 = vcmask (!%p316_p9), 31744  }
  0x14   : > { %v1200_v27 = vpack.c.bf16 (!%p316_p9), %v366_v22, %v365_v21  ;;  %v1202_v28 = vpack.c.bf16 (!%p316_p9), %v384_v24, %v383_v23  ;;  %v367_v29 = vld [vmem:[%s1706_s1 + $0x40] sm:$0xff] (!%p316_p9)  ;;  %v368_v30 = vld [vmem:[%s1706_s1 + $0x48] sm:$0xff] (!%p316_p9)  ;;  %v385_v31 = vld [vmem:[%s1706_s1 + $0xd0] sm:$0xff] (!%p316_p9)  ;;  %v474_v61 = vunpack.c.0.s8 (!%p316_p9), %v473_v58  ;;  %vm597_vm6 = vcmask (!%p316_p9), 64512  }
  0x15   : > { %v386_v32 = vld [vmem:[%s1706_s1 + $0xd8] sm:$0xff] (!%p316_p9)  ;;  %v1204_v33 = vpack.c.bf16 (!%p316_p9), %v368_v30, %v367_v29  ;;  %v369_v35 = vld [vmem:[%s1706_s1 + $0x50] sm:$0xff] (!%p316_p9)  ;;  %v387_v37 = vld [vmem:[%s1706_s1 + $0xe0] sm:$0xff] (!%p316_p9)  ;;  %v469_v63 = vsub.s32 (!%p316_p9), %v466_v59, %v1579_v60  ;;  %v1359_v57 = vmov (!%p316_p9), 1966171168   ;;  %vm845_vm7 = vcmask (!%p316_p9), 261120  }
  0x16   : > { %s354_s12 = scalar_select %p353_p10, %s1437_s17, 1  ;;  %1193 = vmatpush3.bf16.msra.mxu0 %v1192_v13  ;;  %v1206_v34 = vpack.c.bf16 %v386_v32, %v385_v31  ;;  %v370_v36 = vld [vmem:[%s1706_s1 + $0x58] sm:$0xff]  ;;  %v388_v38 = vld [vmem:[%s1706_s1 + $0xe8] sm:$0xff]  ;;  %v371_v41 = vld [vmem:[%s1706_s1 + $0x60] sm:$0xff]  ;;  %v477_v2 = vsub.s32 %v474_v61, %v1579_v60  ;;  %v765_v58 = vunpack.c.l.s4 %v1359_v57 }
  0x17   : > { %1195 = vmatprep.subr.bf16.mxu0 %v1194_v14  ;;  %v1208_v39 = vpack.c.bf16 %v370_v36, %v369_v35  ;;  %v1210_v40 = vpack.c.bf16 %v388_v38, %v387_v37  ;;  %v372_v42 = vld [vmem:[%s1706_s1 + $0x68] sm:$0xff]  ;;  %v389_v43 = vld [vmem:[%s1706_s1 + $0xf0] sm:$0xff]  ;;  %v390_v44 = vld [vmem:[%s1706_s1 + $0xf8] sm:$0xff] }
  0x18   : > { %s1128_s21 = sshll.u32 %s354_s12, 3  ;;  %v1212_v45 = vpack.c.bf16 %v372_v42, %v371_v41  ;;  %v1214_v46 = vpack.c.bf16 %v390_v44, %v389_v43  ;;  %v373_v47 = vld [vmem:[%s1706_s1 + $0x70] sm:$0xff]  ;;  %v374_v48 = vld [vmem:[%s1706_s1 + $0x78] sm:$0xff]  ;;  %v489_v51 = vld [vmem:[%s1708_s3] sm:$0xff]  ;;  %s1129_s12 = sshll.u32 %s1437_s17, 7 }
  0x19   : > { %s357_s22 = scalar_lea.vmem %s1705_s0, %s1128_s21  ;;  %v1216_v49 = vpack.c.bf16 %v374_v48, %v373_v47  ;;  %492 = vperm.xlu0 %1279, %v489_v51   ;;  %v591_v53 = vld [vmem:[%s1710_s5] sm:$0xf]  ;;  %v814_v29 = vld [vmem:[%s1713_s8 + $0x8] sm:$0xff]  ;;  %v816_v30 = vld [vmem:[%s1713_s8 + $0x18] sm:$0xff]  ;;  %s350_s21 = sand.u32 1, %s1344_s14  }
  0x1a   : > { %v1523_v25 = vld [vmem:[%s357_s22] sm:$0xff]  ;;  %1197 = vmatpush3.bf16.msra.mxu0 %v1196_v19  ;;  %v1218_v31 = vpack.c.bf16 %v816_v30, %v814_v29  ;;  %v818_v35 = vld [vmem:[%s1713_s8 + $0x28] sm:$0xff]  ;;  %v820_v36 = vld [vmem:[%s1713_s8 + $0x38] sm:$0xff]  ;;  %s1110_s20 = sshll.u32 %s350_s21, 3  ;;  %s1663_s28 = scalar_lea.hbm %s1715_s10, %s1129_s12 }
  0x1b   : > { %v392_v26 = vcombine.high %v1523_v25, %v1523_v25  ;;  %1199 = vmatprep.subr.bf16.mxu0 %v1198_v20  ;;  %v488_v14 = vld [vmem:[%s1707_s2] sm:$0xff]  ;;  %v1222_v37 = vpack.c.bf16 %v820_v36, %v818_v35  ;;  %v920_v41 = vld [vmem:[%s1714_s9 + $0x8] sm:$0xff]  ;;  %v922_v42 = vld [vmem:[%s1714_s9 + $0x18] sm:$0xff]  ;;  %s352_s25 = scalar_lea.vmem [#allocation2], %s1110_s20  ;;  %s1033_s29 = scalar_lea.sflag [#allocation3], %s350_s21 }
  0x1c   : > { %v678_v16 = vld [vmem:[%s1712_s7] sm:$0xf]  ;;  %v1226_v43 = vpack.c.bf16 %v922_v42, %v920_v41  ;;  %s1047_s26 = sshll.u32 %s352_s25, 4  ;;  %s1360_s17 = smov [#allocation2]   ;;  %s1665_s26 = int_to_ptr.vmem [resolvable:$true] %s1047_s26 }
  0x1d   : > { %458 = vmatprep.mubr.f32.mxu0 %v392_v26  ;;  %594 = vperm.xlu0 %1279, %v591_v53   ;;  %v813_v32 = vld [vmem:[%s1713_s8] sm:$0xff]  ;;  %s1290_s30 = scalar_lea.vmem %s1665_s26, 128  ;;  %s1294_s11 = sshll.u32 %s1360_s17, 4  ;;  %s1295_s11 = int_to_ptr.vmem [resolvable:$false] %s1294_s11 }
  0x1e   : > { %1201 = vmatpush3.bf16.msra.mxu0 %v1200_v27  ;;  %681 = vperm.xlu1 %1280, %v678_v16   ;;  %v590_v27 = vld [vmem:[%s1709_s4] sm:$0xf]  ;;  %v926_v16 = vld [vmem:[%s1714_s9 + $0x38] sm:$0xff]  ;;  %p1291_p11 = scmp.ne.s32.totalorder %s1665_s26, %s1290_s30  ;;  %s1296_s18 = scalar_lea.vmem %s1295_s11, 256 }
  0x1f   : > { %1203 = vmatprep.subr.bf16.mxu0 %v1202_v28  ;;  %v677_v28 = vld [vmem:[%s1711_s6] sm:$0xf]  ;;  %p1297_p0 = scmp.lt.s32.totalorder %s1665_s26, %s1295_s11  ;;  %p1298_p1 = scmp.lt.s32.totalorder %s1296_s18, %s1290_s30 }
  0x20   : > { %v817_v38 = vld [vmem:[%s1713_s8 + $0x20] sm:$0xff]  ;;  %p1292_p12 = pnand %p1291_p11, %p1454_p5 }
  0x21   : > { %p1299_p2 = por %p1298_p1, %p1297_p0 }
  0x22   : > { %1205 = vmatpush3.bf16.msra.mxu0 %v1204_v33  ;;  %v815_v33 = vld [vmem:[%s1713_s8 + $0x10] sm:$0xff]  ;;  %p1293_p13 = pneg %p1292_p12 }
  0x23   : > { %1207 = vmatprep.subr.bf16.mxu0 %v1206_v34  ;;  %v1220_v34 = vpack.c.bf16 %v815_v33, %v813_v32 }
  0x24   : > { %p1300_p3 = pnand %p1299_p2, %p1293_p13 }
  0x26   : > { %1209 = vmatpush3.bf16.msra.mxu0 %v1208_v39  ;;  %v819_v39 = vld [vmem:[%s1713_s8 + $0x30] sm:$0xff] }
  0x27   : > { %1211 = vmatprep.subr.bf16.mxu0 %v1210_v40  ;;  %v1224_v40 = vpack.c.bf16 %v819_v39, %v817_v38 }
  0x2a   : > { %1213 = vmatpush3.bf16.msra.mxu0 %v1212_v45 }
  0x2b   : > { %1215 = vmatprep.subr.bf16.mxu0 %v1214_v46 }
  0x2e   : > { %1217 = vmatpush3.bf16.msra.mxu0 %v1216_v49 }
  0x31   : > { %459 = vmatmul.mubr.f32.vlgmr.msra.gmra.mrb[0].mxu0 %v1523_v25 }
  0x98   : > { %v493_v17 = vpop.permute.xlu0 %492 }
  0x9c   : > { %v595_v44 = vpop.permute.xlu0 %594 }
  0x9d   : > { %v682_v48 = vpop.permute.xlu1 %681 }
 0x104   : > { %v1162_v62 = vpop.f32.mrb[0].mxu0 }
 0x105   : > { %v1163_v0 = vpop.f32.mrb[1].mxu0 }
 0x106   : > { %v1164_v1 = vadd.f32 %v1163_v0, %v1162_v62  ;;  %v766_v62 = vunpack.c.0.s8 %v765_v58 }
 0x108   : > { %v470_v3 = vrot.slane %v1164_v1, %v469_v63  ;;  %v769_v63 = vsub.s32 %v766_v62, %v1579_v60  ;;  %v921_v60 = vld [vmem:[%s1714_s9 + $0x10] sm:$0xff] }
 0x10a   : > { %v471_v4 = vcombine.high %v470_v3, %v1354_v50  ;;  %v478_v5 = vrot.slane %v470_v3, %v477_v2 }
 0x10c   : > { %v485_v6 = vrot.slane %v471_v4, %v477_v2  ;;  %v486_v7 = vcombine.high %v478_v5, %v1354_v50 }
 0x10e   : > { %v499_v8 = vrot.slane %v486_v7, 7  ;;  %v487_v9 = vcombine.high %v485_v6, %v1354_v50  ;;  %v502_v10 = vrot.slane %v485_v6, 6 }
 0x110   : > { %v501_v11 = vsel %vm500_vm1, %v499_v8, %v478_v5  ;;  %v505_v12 = vrot.slane %v487_v9, 5 }
 0x111   : > { %v504_v13 = vsel %vm503_vm2, %v502_v10, %v501_v11 }
 0x112   : > { %v507_v15 = vsel %vm506_vm3, %v505_v12, %v504_v13 }
 0x113   : > { %1172 = vmatpush3.msk.msra.mxu1 %vm512_vm4, %v507_v15  ;;  %v924_v15 = vld [vmem:[%s1714_s9 + $0x28] sm:$0xff] }
 0x114   : > { %1174 = vmatmul.mubr.msk.f32.vlgmr.msra.gmra.mrb[0].mxu1 %vm508_vm5, %v488_v14  ;;  %1176 = vmatprep.subr.mxu1 %v1354_v50  ;;  %v919_v14 = vld [vmem:[%s1714_s9] sm:$0xff] }
 0x115   : > { %1178 = vmatprep.mubr.msk.f32.mxu1 %vm1355_vm0, %v1354_v50 }
 0x1e7   : > { %v581_v18 = vpop.f32.mrb[0].mxu1 }
 0x1e8   : > { %v582_v19 = vadd.f32 %v581_v18, %v493_v17  ;;  %v1175_v20 = vpop.f32.mrb[1].mxu1 }
 0x1e9   : > { %v1228_v20 = vpack.c.bf16 %v921_v60, %v919_v14 }
 0x1ea   : > { %v585_v21 = vadd.f32 3.0, %v582_v19 }
 0x1ec   : > { %v586_v22 = vmax.f32 %v585_v21, 0.0 }
 0x1ee   : > { %v587_v23 = vmin.f32 %v586_v22, 6.0  ;;  %v1230_v22 = vpack.c.bf16 %v926_v16, %v924_v15 }
 0x1f0   : > { %v588_v24 = vmul.f32 %v587_v23, %v582_v19  ;;  %v923_v23 = vld [vmem:[%s1714_s9 + $0x20] sm:$0xff] }
 0x1f2   : > { %v589_v26 = vmul.f32 0.16666667, %v588_v24  ;;  %v925_v24 = vld [vmem:[%s1714_s9 + $0x30] sm:$0xff] }
 0x1f3   : > { %v1232_v29 = vpack.c.bf16 %v925_v24, %v923_v23 }
 0x1f4   : > { %1177 = vmatpush3.msra.mxu1 %v589_v26 }
 0x1f5   : > { %1179 = vmatmul.mubr.msk.f32.vlgmr.msra.gmra.mrb[2].mxu1 %vm597_vm6, %v590_v27  ;;  %1181 = vmatprep.subr.mxu1 %v1354_v50 }
 0x1f6   : > { %1182 = vmatpush3.msra.mxu1 %v589_v26  ;;  %1183 = vmatprep.mubr.msk.f32.mxu1 %vm1355_vm0, %v1354_v50 }
 0x1f7   : > { %1219 = vmatprep.subr.bf16.mxu1 %v1218_v31 }
 0x1f9   : > { %1184 = vmatmul.mubr.msk.f32.vlgmr.msra.gmra.mrb[4].mxu1 %vm597_vm6, %v677_v28 }
 0x1fa   : > { %912 = vmatprep.mubr.f32.mxu1 %v1354_v50  ;;  %1221 = vmatpush1.bf16.msra.mxu1 %v1220_v34 }
 0x1fb   : > { %1223 = vmatprep.subr.bf16.mxu1 %v1222_v37 }
 0x1fe   : > { %1225 = vmatpush1.bf16.msra.mxu1 %v1224_v40 }
 0x1ff   : > { %1227 = vmatprep.subr.bf16.mxu1 %v1226_v43 }
 0x2c8   : > { %v667_v45 = vpop.f32.mrb[2].mxu1 }
 0x2c9   : > { %v668_v46 = vadd.f32 %v667_v45, %v595_v44  ;;  %v1180_v47 = vpop.f32.mrb[3].mxu1 }
 0x2cb   : > { %v1116_v49 = vmul.f32 -1.442695, %v668_v46 }
 0x2cc   : > { %v753_v51 = vpop.f32.mrb[4].mxu1 }
 0x2cd   : > { %1282 = vpow2.f32 %v1116_v49  ;;  %v754_v52 = vadd.f32 %v753_v51, %v682_v48  ;;  %v1185_v53 = vpop.f32.mrb[5].mxu1 }
 0x2cf   : > { %v1118_v54 = vmul.f32 -1.442695, %v754_v52 }
 0x2d1   : > { %1284 = vpow2.f32 %v1118_v54 }
 0x2d7   : > { %v1283_v55 = vpop.eup %1282 }
 0x2d8   : > { %v674_v56 = vadd.f32 1.0, %v1283_v55 }
 0x2da   : > { %1286 = vrcp.f32 %v674_v56 }
 0x2db   : > { %v1285_v59 = vpop.eup %1284 }
 0x2dc   : > { %v760_v61 = vadd.f32 1.0, %v1285_v59 }
 0x2de   : > { %1288 = vrcp.f32 %v760_v61 }
 0x2e4   : > { %v1287_v0 = vpop.eup %1286 }
 0x2e5   : > { %v770_v1 = vrot.slane %v1287_v0, %v769_v63 }
 0x2e7   : > { %v771_v2 = vcombine.high %v770_v1, %v770_v1  ;;  %v778_v3 = vrot.slane %v770_v1, %v769_v63 }
 0x2e8   : > { %v1289_v4 = vpop.eup %1288 }
 0x2e9   : > { %v785_v5 = vrot.slane %v771_v2, %v769_v63  ;;  %v795_v6 = vrot.slane %v1289_v4, %v769_v63 }
 0x2eb   : > { %v796_v7 = vcombine.high %v795_v6, %v795_v6  ;;  %v803_v8 = vrot.slane %v795_v6, %v769_v63  ;;  %v821_v9 = vcombine.low %v778_v3, %v785_v5  ;;  %v1119_v10 = vcombine.high %v778_v3, %v785_v5 }
 0x2ed   : > { %v810_v11 = vrot.slane %v796_v7, %v769_v63  ;;  %v829_v12 = vrot.slane %v821_v9, %v769_v63  ;;  %v836_v13 = vrot.slane %v1119_v10, %v769_v63 }
 0x2ef   : > { %v837_v17 = vcombine.low %v829_v12, %v836_v13  ;;  %v927_v18 = vcombine.low %v803_v8, %v810_v11  ;;  %v1121_v19 = vcombine.high %v803_v8, %v810_v11 }
 0x2f1   : > { %v844_v21 = vrot.slane %v837_v17, %v769_v63  ;;  %v935_v26 = vrot.slane %v927_v18, %v769_v63  ;;  %v942_v27 = vrot.slane %v1121_v19, %v769_v63 }
 0x2f3   : > { %1120 = vmatmul.mubr.msk.f32.vlgmr.msra.gmra.mrb[6].mxu1 %vm845_vm7, %v844_v21  ;;  %v943_v28 = vcombine.low %v935_v26, %v942_v27 }
 0x2f4   : > { %1229 = vmatpush1.bf16.msra.mxu1 %v1228_v20  ;;  %1017 = vmatprep.mubr.f32.mxu1 %v1354_v50 }
 0x2f5   : > { %1231 = vmatprep.subr.bf16.mxu1 %v1230_v22  ;;  %v950_v30 = vrot.slane %v943_v28, %v769_v63 }
 0x2f8   : > { %1233 = vmatpush1.bf16.msra.mxu1 %v1232_v29 }
 0x2fb   : > { %1122 = vmatmul.mubr.msk.f32.vlgmr.msra.gmra.mrb[8].mxu1 %vm845_vm7, %v950_v30 }
 0x3c6   : > { %v914_v31 = vpop.f32.mrb[6].mxu1 }
 0x3c7   : > { %v916_v32 = vpop.f32.mrb[7].mxu1 }
 0x3ce   : > { %v1019_v33 = vpop.f32.mrb[8].mxu1 }
 0x3cf   : > { %v1024_v34 = vmul.f32 %v1019_v33, %v914_v31  ;;  %v1021_v35 = vpop.f32.mrb[9].mxu1 }
 0x3d0   : > { %v1025_v36 = vmul.f32 %v1021_v35, %v916_v32 }
 0x3d2   : > { %v1028_v37 = vcombine.low %v1024_v34, %v1025_v36 }
 0x3d4   : > { %v1030_v50 = vmul.f32 %v1028_v37, %v1523_v25 }
 0x3d6   : > { %1031 = vst [vmem:[%s352_s25] sm:$0xff] %v1030_v50 }
 0x3d7   : > { %1303 = shalt.err (!%p1300_p3)
}
 0x3d8   : > { %s1304_s21 = scalar_lea.hbm %s1663_s28, 128  ;;  %s1308_s25 = scalar_lea.hbm %s1715_s10, 256 }
 0x3d9   : > { %p1305_p4 = scmp.ne.s32.totalorder %s1663_s28, %s1304_s21  ;;  %p1309_p9 = scmp.lt.u32.totalorder %s1663_s28, %s1715_s10 }
 0x3da   : > { %p1310_p10 = scmp.lt.u32.totalorder %s1308_s25, %s1304_s21  ;;  %p1312_p12 = scmp.lt.u32.totalorder %s1304_s21, %s1663_s28 }
 0x3db   : > { %p1306_p7 = pnand %p1305_p4, %p1454_p5 }
 0x3dc   : > { %p1311_p11 = por %p1310_p10, %p1309_p9 }
 0x3dd   : > { %p1307_p8 = pneg %p1306_p7 }
 0x3de   : > { %p1313_p13 = por %p1312_p12, %p1311_p11 }
 0x3e0   : > { %p1314_p0 = pnand %p1313_p13, %p1307_p8 }
 0x3e2   : > { %1317 = shalt.err (!%p1314_p0)
}
 0x3e3   : > { %1234 = dma.vmem_to_hbm [thread:$0]  (%p1454_p5), %s1665_s26, 128, %s1663_s28, %s1033_s29  }
 0x3e4 PF: > { %p1240_p1 = scmp.ge.s32.totalorder %s1352_s16, 2  ;;  %s1059_s30 = sand.u32 1, %s1340_s13  }
 0x3e5   : > { %s1060_s17 = scalar_lea.sflag [#allocation3], %s1059_s30 }
 0x3e6   : > { %p1237_p2 = pnand %p1240_p1, %p1458_p6 }
 0x3e8   : > { %1335 = dma.done.wait (!%p1237_p2), %s1060_s17, 128  }
 0x3e9   : > { %1337 = vsyncadd (!%p1237_p2), %s1060_s17, 4294967168  ;;  %s1719_s11 = sld [smem:[#allocation5_spill]]  ;;  %p20_p3 = scmp.ge.s32.totalorder %s1441_s19, 4  }
 0x3ea   : > { %s1720_s13 = smov %s1344_s14  ;;  %s1721_s14 = smov %s1348_s15 }
 0x3eb   : > { %s1723_s16 = smov %s1441_s19  ;;  %22 = sbr.rel (!%p20_p3) target bundleno = 3 (0x3), region = 95 }
 0x3ef   : > { %s1722_s15 = smov %s1719_s11 }
 0x3f2   :  { %1065 = vsyncpa [#allocation3], 1 }
 0x3f3   :  { %1067 = vsyncpa [#allocation3 + $0x1], 1 }

</bundles_post_ra>
